<compile_context>
chip_gen: v5e
topology: v5e:2x2
jax: 0.10.0
libtpu: 0.0.40
codegen_flags: <defaults>
</compile_context>

<pallas_src>
import jax
import jax.numpy as jnp
from jax.experimental import pallas as pl
from jax.experimental.pallas import tpu as pltpu


def _spectral_filter_kernel(lam_ref, pack_ref, out_ref):
    # lam_ref : (1, t)   eigenvalues for this stripe's diagonal sub-block
    # pack_ref: (H, 4)   columns = [w1 | b1 | w2 | b2 (replicated)]
    # out_ref : (t, kp)  row stripe of the dense diagonal matrix
    i = pl.program_id(0)
    t, kp = out_ref.shape

    # Zero-fill the whole stripe: lane-dense (last dim = kp) unmasked stores.
    out_ref[...] = jnp.zeros_like(out_ref)

    # --- tiny MLP for the t eigenvalues of this stripe (k lives on lanes) ---
    lam = lam_ref[...]                        # (1, t)
    w1 = pack_ref[:, 0:1]                     # (H, 1)
    b1 = pack_ref[:, 1:2]                     # (H, 1)
    w2 = pack_ref[:, 2:3]                     # (H, 1)
    b2 = pack_ref[0:1, 3:4]                   # (1, 1)

    # Layer 1: Linear(1 -> H) + ReLU.  Broadcast / outer product on the VPU.
    h = jnp.maximum(w1 * lam + b1, 0.0)       # (H, t)

    # Layer 2: Linear(H -> 1).  Sublane reduction (XLU); H is tiny — no MXU.
    z = jnp.sum(h * w2, axis=0, keepdims=True) + b2   # (1, t)

    # Sigmoid on the EUP.
    w = jax.nn.sigmoid(z)                     # (1, t)

    # Diagonal (t, t) sub-block: entry (r, c) = w[c] iff r == c.
    row = jax.lax.broadcasted_iota(jnp.int32, (t, t), 0)
    col = jax.lax.broadcasted_iota(jnp.int32, (t, t), 1)
    diag_block = jnp.where(row == col, w, 0.0)

    # Store the diag band at column offset i*t.  Statically unrolled
    # pl.when-guarded static slices (exactly one fires per program) — avoids
    # dynamic lane-offset slicing while keeping the stores aligned.
    for j in range(kp // t):
        @pl.when(i == j)
        def _(j=j):
            out_ref[:, j * t:(j + 1) * t] = diag_block


def _pick_stripe(kp, budget_bytes=16 * 1024 * 1024):
    """Stripe height t: largest multiple of 128 dividing kp such that the
    double-buffered (t, kp) f32 output block fits in budget_bytes; keep >= 2
    stripes when kp allows it (so v7x can shard across its 2 TensorCores)."""
    m = kp // 128
    for d in range(m, 0, -1):
        if m % d:
            continue
        if m >= 2 and d == m:
            continue                       # ensure at least 2 stripes
        if 2 * (128 * d) * kp * 4 <= budget_bytes:
            return 128 * d
    return 128


def spectral_filter_mlp(eigenvalues, params, k):
    """JAX wrapper mirroring SpectralFilterMLP.forward (returns (k, k) f32)."""
    w1, b1, w2, b2 = params  # torch layout: w1 (H,1), b1 (H,), w2 (1,H), b2 (1,)
    H = w1.shape[0]

    if eigenvalues.shape[0] < k:
        raise ValueError(
            f"eigenvalues has {eigenvalues.shape[0]} entries, need at least k={k}")

    # Pad k up to a lane-dense multiple of 128; padded rows/cols are sliced off
    # at the end, so no in-kernel masking is needed.
    kp = max(128, ((k + 127) // 128) * 128)

    lam = eigenvalues[:k].astype(jnp.float32)
    lam_row = jnp.zeros((1, kp), jnp.float32).at[0, :k].set(lam)

    # Pack every parameter into one small (H, 4) VMEM input.
    b2_scalar = jnp.asarray(b2, jnp.float32).reshape(())
    pack = jnp.stack(
        [
            jnp.asarray(w1, jnp.float32).reshape(H),
            jnp.asarray(b1, jnp.float32).reshape(H),
            jnp.asarray(w2, jnp.float32).reshape(H),
            jnp.full((H,), b2_scalar, dtype=jnp.float32),
        ],
        axis=1,
    )  # (H, 4)

    t = _pick_stripe(kp)
    grid = (kp // t,)

    out_padded = pl.pallas_call(
        _spectral_filter_kernel,
        out_shape=jax.ShapeDtypeStruct((kp, kp), jnp.float32),
        grid_spec=pltpu.PrefetchScalarGridSpec(
            num_scalar_prefetch=0,
            grid=grid,
            in_specs=[
                # Eigenvalues for this stripe's diagonal columns.
                pl.BlockSpec((1, t), lambda i: (0, i)),
                # Packed parameters: same tiny block for every program.
                pl.BlockSpec((H, 4), lambda i: (0, 0)),
            ],
            # Full-width row stripe: last dim kp -> unmasked lane-dense stores.
            out_specs=pl.BlockSpec((t, kp), lambda i: (i, 0)),
        ),
        compiler_params=pltpu.CompilerParams(
            dimension_semantics=("parallel",),
            vmem_limit_bytes=32 * 1024 * 1024,  # v5e scoped default is only 16 MiB
        ),
    )(lam_row, pack)

    return out_padded if kp == k else out_padded[:k, :k]


def init_params(key, hidden_dim):
    """Deterministic init matching nn.Linear shapes (torch convention: (out, in))."""
    k1, k2, k3, k4 = jax.random.split(key, 4)
    bound1 = 1.0 / jnp.sqrt(1.0)           # fan_in = 1
    bound2 = 1.0 / jnp.sqrt(hidden_dim)    # fan_in = hidden_dim
    w1 = jax.random.uniform(k1, (hidden_dim, 1), jnp.float32, -bound1, bound1)
    b1 = jax.random.uniform(k2, (hidden_dim,), jnp.float32, -bound1, bound1)
    w2 = jax.random.uniform(k3, (1, hidden_dim), jnp.float32, -bound2, bound2)
    b2 = jax.random.uniform(k4, (1,), jnp.float32, -bound2, bound2)
    return w1, b1, w2, b2


def reference(eigenvalues, params, k):
    """Pure-JAX reference of the PyTorch forward, for sanity checking."""
    w1, b1, w2, b2 = params
    lam = eigenvalues[:k].reshape(k, 1)
    h = jnp.maximum(lam @ w1.T + b1, 0.0)
    z = h @ w2.T + b2
    w = jax.nn.sigmoid(z).reshape(k)
    return jnp.diag(w)


if __name__ == "__main__":
    key = jax.random.PRNGKey(0)
    k_eig, k_param = jax.random.split(key)

    K = 8
    HIDDEN = 16
    N_EIG = 16

    eigenvalues = jax.random.uniform(k_eig, (N_EIG,), jnp.float32, 0.0, 2.0)
    params = init_params(k_param, HIDDEN)

    out = spectral_filter_mlp(eigenvalues, params, K)
    out = jax.block_until_ready(out)

    ref = reference(eigenvalues, params, K)
    assert out.shape == (K, K)
    assert jnp.allclose(out, ref, atol=1e-5, rtol=1e-5), "mismatch vs reference"

    print("KERNEL_OK")
</pallas_src>

<mosaic_0001>
module attributes {stable_mosaic.version = 11 : i64} {
  func.func @_spectral_filter_kernel(%arg0: i32, %arg1: memref<1x128xf32, #tpu.memory_space<vmem>>, %arg2: memref<16x4xf32, #tpu.memory_space<vmem>>, %arg3: memref<128x128xf32, #tpu.memory_space<vmem>>) attributes {dimension_semantics = [#tpu.dimension_semantics<parallel>], iteration_bounds = array<i64: 1>, scalar_prefetch = 0 : i64, scratch_operands = 0 : i64, tpu.core_type = #tpu.core_type<tc>, window_params = [{transform_indices = @transform_0, window_bounds = array<i64: 1, 128>}, {pipeline_mode = #tpu.pipeline_mode<synchronous>, transform_indices = @transform_1, window_bounds = array<i64: 16, 4>}, {transform_indices = @transform_2, window_bounds = array<i64: 128, 128>}]} {
    %cst = arith.constant 0.000000e+00 : f32
    %0 = vector.broadcast %cst : f32 to vector<128x128xf32>
    %c0 = arith.constant 0 : index
    %c0_0 = arith.constant 0 : index
    %1 = vector.load %arg3[%c0, %c0_0] : memref<128x128xf32, #tpu.memory_space<vmem>>, vector<128x128xf32>
    tpu.vector_store %arg3[%c0, %c0_0], %0 {strides = array<i32>} : memref<128x128xf32, #tpu.memory_space<vmem>>, vector<128x128xf32>,
    %c0_1 = arith.constant 0 : index
    %c0_2 = arith.constant 0 : index
    %2 = vector.load %arg1[%c0_1, %c0_2] : memref<1x128xf32, #tpu.memory_space<vmem>>, vector<1x128xf32>
    %c0_3 = arith.constant 0 : index
    %c0_4 = arith.constant 0 : index
    %3 = vector.load %arg2[%c0_3, %c0_4] : memref<16x4xf32, #tpu.memory_space<vmem>>, vector<16x1xf32>
    %c0_5 = arith.constant 0 : index
    %c1 = arith.constant 1 : index
    %4 = vector.load %arg2[%c0_5, %c1] : memref<16x4xf32, #tpu.memory_space<vmem>>, vector<16x1xf32>
    %c0_6 = arith.constant 0 : index
    %c2 = arith.constant 2 : index
    %5 = vector.load %arg2[%c0_6, %c2] : memref<16x4xf32, #tpu.memory_space<vmem>>, vector<16x1xf32>
    %c0_7 = arith.constant 0 : index
    %c3 = arith.constant 3 : index
    %6 = vector.load %arg2[%c0_7, %c3] : memref<16x4xf32, #tpu.memory_space<vmem>>, vector<1x1xf32>
    %7 = vector.broadcast %3 : vector<16x1xf32> to vector<16x128xf32>
    %8 = vector.broadcast %2 : vector<1x128xf32> to vector<16x128xf32>
    %9 = arith.mulf %7, %8 : vector<16x128xf32>
    %10 = vector.broadcast %4 : vector<16x1xf32> to vector<16x128xf32>
    %11 = arith.addf %9, %10 : vector<16x128xf32>
    %cst_8 = arith.constant 0.000000e+00 : f32
    %12 = vector.broadcast %cst_8 : f32 to vector<16x128xf32>
    %13 = arith.maximumf %11, %12 : vector<16x128xf32>
    %14 = vector.broadcast %5 : vector<16x1xf32> to vector<16x128xf32>
    %15 = arith.mulf %13, %14 : vector<16x128xf32>
    %cst_9 = arith.constant dense<0.000000e+00> : vector<128xf32>
    %16 = vector.multi_reduction <add>, %15, %cst_9 [0] : vector<16x128xf32> to vector<128xf32>
    %17 = vector.shape_cast %16 : vector<128xf32> to vector<1x128xf32>
    %18 = vector.broadcast %6 : vector<1x1xf32> to vector<1x128xf32>
    %19 = arith.addf %17, %18 : vector<1x128xf32>
    %20 = arith.negf %19 : vector<1x128xf32>
    %21 = math.exp %20 : vector<1x128xf32>
    %cst_10 = arith.constant 1.000000e+00 : f32
    %22 = vector.broadcast %cst_10 : f32 to vector<1x128xf32>
    %23 = arith.addf %22, %21 : vector<1x128xf32>
    %24 = arith.divf %22, %23 : vector<1x128xf32>
    %25 = tpu.iota {dimensions = array<i32: 0>} : vector<128x128xi32>
    %26 = tpu.iota {dimensions = array<i32: 1>} : vector<128x128xi32>
    %27 = arith.cmpi eq, %25, %26 : vector<128x128xi32>
    %cst_11 = arith.constant 0.000000e+00 : f32
    %28 = vector.shape_cast %24 : vector<1x128xf32> to vector<1x128xf32>
    %29 = vector.broadcast %28 : vector<1x128xf32> to vector<128x128xf32>
    %30 = vector.broadcast %cst_11 : f32 to vector<128x128xf32>
    %31 = arith.select %27, %29, %30 : vector<128x128xi1>, vector<128x128xf32>
    %c0_i32 = arith.constant 0 : i32
    %32 = arith.cmpi eq, %arg0, %c0_i32 : i32
    %33 = arith.extui %32 : i1 to i32
    %c0_i32_12 = arith.constant 0 : i32
    %34 = arith.cmpi ne, %33, %c0_i32_12 : i32
    scf.if %34 {
      %c0_13 = arith.constant 0 : index
      %c0_14 = arith.constant 0 : index
      %35 = vector.load %arg3[%c0_13, %c0_14] : memref<128x128xf32, #tpu.memory_space<vmem>>, vector<128x128xf32>
      tpu.vector_store %arg3[%c0_13, %c0_14], %31 {strides = array<i32>} : memref<128x128xf32, #tpu.memory_space<vmem>>, vector<128x128xf32>,
    } else {
    }
    return
  }
  func.func @transform_0(%arg0: i32) -> (i32, i32) {
    %c0_i32 = arith.constant 0 : i32
    %c0_i32_0 = arith.constant 0 : i32
    return %c0_i32, %arg0 : i32, i32
  }
  func.func @transform_1(%arg0: i32) -> (i32, i32) {
    %c0_i32 = arith.constant 0 : i32
    %c0_i32_0 = arith.constant 0 : i32
    %c0_i32_1 = arith.constant 0 : i32
    return %c0_i32, %c0_i32_0 : i32, i32
  }
  func.func @transform_2(%arg0: i32) -> (i32, i32) {
    %c0_i32 = arith.constant 0 : i32
    %c0_i32_0 = arith.constant 0 : i32
    return %arg0, %c0_i32 : i32, i32
  }
}

</mosaic_0001>

<bundles_post_ra>
// kernel: tpu_custom_call.1
= control target key start
LH: loop header
LB: loop body
LE: loop exit
PB: predicated region body
PF: predicated region fallthrough
CT: control target
= control target key end

     0   :  { %v235_v1 = vmov 1   ;;  %v236_v2 = vmov 0   ;;  %s290_s0 = inlined_call_operand.vmem [shape: f32[1,128], index: 0, kind: input, shape index: {}]   ;;  %s291_s1 = inlined_call_operand.vmem [shape: f32[16,4], index: 1, kind: input, shape index: {}]   ;;  %s292_s2 = inlined_call_operand.hbm [shape: f32[128,128], index: 2, kind: output, shape index: {}]  }
   0x1   :  { %v29_v0 = vld [vmem:[%s291_s1] sm:$0xff]  ;;  %201 = vset.pattern.permute.xlu1 %v235_v1  ;;  %200 = vset.pattern.permute.xlu0 %v236_v2 }
   0x2   :  { %7 = vsyncpa [#allocation3], 0  ;;  %48 = vperm.xlu1 %201, %v29_v0   ;;  %34 = vperm.xlu0 %200, %v29_v0   ;;  %v237_v3 = vmov 2   ;;  %v30_v4 = vld [vmem:[%s291_s1 + $0x8] sm:$0xff]  ;;  %v31_v5 = vld [vmem:[%s291_s1] sm:$0x1]  ;;  %v101_v34 = vlaneseq }
   0x3   :  { %202 = vset.pattern.permute.xlu2 %v237_v3  ;;  %v238_v6 = vmov 3   ;;  %v204_v7 = vld [vmem:[%s290_s0] ss:$0 sm:$0xff]  ;;  %s239_s0 = smov [#allocation2]   ;;  %s179_s19 = sshll.u32 %s292_s2, 4  ;;  %s180_s19 = int_to_ptr.hbm [resolvable:$true] %s179_s19 }
   0x4   :  { %60 = vperm.xlu2 %202, %v29_v0   ;;  %v102_v37 = vshrl.u32 %v101_v34, 7  ;;  %v269_v44 = vand.u32 127, %v101_v34  ;;  %s177_s1 = sshll.u32 %s239_s0, 4  ;;  %s240_s20 = smov 128   ;;  %s178_s1 = int_to_ptr.vmem [resolvable:$true] %s177_s1 }
   0x5   :  { %s241_s21 = smov 8  }
   0x6   :  { %v103_v42 = vadd.s32 8, %v102_v37  ;;  %v104_v43 = vadd.s32 16, %v102_v37  ;;  %v105_v46 = vadd.s32 24, %v102_v37  ;;  %v106_v48 = vadd.s32 32, %v102_v37 }
   0x7   :  { %v107_v50 = vadd.s32 40, %v102_v37  ;;  %v108_v51 = vadd.s32 48, %v102_v37  ;;  %vm120_vm4 = vcmp.eq.s32.totalorder %v102_v37, %v269_v44  ;;  %v109_v54 = vadd.s32 56, %v102_v37 }
   0x8   :  { %vm121_vm5 = vcmp.eq.s32.totalorder %v103_v42, %v269_v44  ;;  %vm122_vm6 = vcmp.eq.s32.totalorder %v104_v43, %v269_v44  ;;  %vm123_vm7 = vcmp.eq.s32.totalorder %v105_v46, %v269_v44  ;;  %v110_v55 = vadd.s32 64, %v102_v37 }
   0x9   :  { %v111_v56 = vadd.s32 72, %v102_v37  ;;  %vm124_vm8 = vcmp.eq.s32.totalorder %v106_v48, %v269_v44  ;;  %vm125_vm9 = vcmp.eq.s32.totalorder %v107_v50, %v269_v44  ;;  %v112_v60 = vadd.s32 80, %v102_v37 }
   0xa   :  { %52 = vperm.xlu1 %201, %v30_v4   ;;  %39 = vperm.xlu0 %200, %v30_v4   ;;  %vm126_vm10 = vcmp.eq.s32.totalorder %v108_v51, %v269_v44  ;;  %v113_v62 = vadd.s32 88, %v102_v37  ;;  %vm127_vm11 = vcmp.eq.s32.totalorder %v109_v54, %v269_v44  ;;  %v114_v0 = vadd.s32 96, %v102_v37 }
   0xb   :  { %vm128_vm12 = vcmp.eq.s32.totalorder %v110_v55, %v269_v44  ;;  %v115_v2 = vadd.s32 104, %v102_v37  ;;  %vm129_vm13 = vcmp.eq.s32.totalorder %v111_v56, %v269_v44  ;;  %vm130_vm14 = vcmp.eq.s32.totalorder %v112_v60, %v269_v44 }
   0xc   :  { %64 = vperm.xlu2 %202, %v30_v4   ;;  %v116_v4 = vadd.s32 112, %v102_v37  ;;  %vm131_vm15 = vcmp.eq.s32.totalorder %v113_v62, %v269_v44 }
  0x12   :  { %203 = vset.pattern.permute.xlu0 %v238_v6  ;;  %v117_v6 = vadd.s32 120, %v102_v37 }
  0x13   :  { %78 = vperm.xlu0 %203, %v31_v5  }
  0x5e   :  { %v61_v11 = vpop.permute.xlu2 %60 }
  0x66   :  { %v65_v19 = vpop.permute.xlu2 %64 }
  0x74   :  { %v49_v8 = vpop.permute.xlu1 %48  ;;  %v35_v9 = vpop.permute.xlu0 %34 }
  0x75   :  { %v45_v10 = vmul.f32 %v204_v7, %v35_v9 }
  0x77   :  { %v55_v12 = vadd.f32 %v49_v8, %v45_v10 }
  0x79   :  { %v57_v16 = vmax.f32 %v55_v12, 0.0 }
  0x7b   :  { %v67_v20 = vmul.f32 %v61_v11, %v57_v16 }
  0x7c   :  { %v40_v13 = vpop.permute.xlu0 %39  ;;  %v53_v15 = vpop.permute.xlu1 %52 }
  0x7d   :  { %v46_v14 = vmul.f32 %v204_v7, %v40_v13 }
  0x7f   :  { %v56_v17 = vadd.f32 %v53_v15, %v46_v14 }
  0x81   :  { %v58_v18 = vmax.f32 %v56_v17, 0.0 }
  0x83   :  { %v68_v21 = vmul.f32 %v65_v19, %v58_v18 }
  0x85   :  { %v69_v22 = vadd.f32 %v68_v21, %v67_v20  ;;  %v79_v28 = vpop.permute.xlu0 %78 }
  0x87   :  { %v70_v23 = vrot.slane %v69_v22, 4 }
  0x89   :  { %v71_v24 = vadd.f32 %v70_v23, %v69_v22 }
  0x8b   :  { %v72_v25 = vrot.slane %v71_v24, 2 }
  0x8d   :  { %v73_v26 = vadd.f32 %v72_v25, %v71_v24 }
  0x8f   :  { %v74_v27 = vrot.slane %v73_v26, 1 }
  0x91   :  { %v75_v29 = vadd.f32 %v74_v27, %v73_v26 }
  0x93   :  { %v81_v30 = vadd.f32 %v79_v28, %v75_v29 }
  0x95   :  { %v191_v31 = vmul.f32 -1.442695, %v81_v30 }
  0x97   :  { %205 = vpow2.f32 %v191_v31 }
  0x9d   :  { %v206_v32 = vpop.eup %205 }
  0x9e   :  { %v85_v33 = vadd.f32 1.0, %v206_v32 }
  0xa0   :  { %207 = vrcp.f32 %v85_v33  ;;  %v97_v39 = vand.u32 2147483648, %v85_v33  ;;  %v95_v41 = vand.u32 2147483647, %v85_v33  ;;  %vm91_vm1 = vweird.f32 %v85_v33 }
  0xa2   :  { %v98_v47 = vor.u32 1.1754944e-38, %v97_v39  ;;  %vm96_vm3 = vcmp.eq.f32.partialorder %v95_v41, 8.507059e+37 }
  0xa6   :  { %v208_v35 = vpop.eup %207 }
  0xa7   :  { %v87_v36 = vmul.f32 %v208_v35, %v85_v33  ;;  %vm92_vm0 = vweird.f32 %v208_v35 }
  0xa8   :  { %vm93_vm2 = vmor %vm91_vm1, %vm92_vm0  ;;  %vm132_vm0 = vcmp.eq.s32.totalorder %v114_v0, %v269_v44  ;;  %vm133_vm1 = vcmp.eq.s32.totalorder %v115_v2, %v269_v44 }
  0xa9   :  { %v88_v38 = vsub.f32 1.0, %v87_v36 }
  0xab   :  { %v89_v40 = vmul.f32 %v208_v35, %v88_v38 }
  0xad   :  { %v90_v45 = vadd.f32 %v208_v35, %v89_v40 }
  0xaf   :  { %v94_v49 = vsel %vm93_vm2, %v208_v35, %v90_v45  ;;  %vm134_vm2 = vcmp.eq.s32.totalorder %v116_v4, %v269_v44 }
  0xb0   :  { %v99_v52 = vsel %vm96_vm3, %v98_v47, %v94_v49  ;;  %vm135_vm3 = vcmp.eq.s32.totalorder %v117_v6, %v269_v44 }
  0xb1   :  { %v136_v53 = vperm.slane %v99_v52, 0 }
  0xb3   :  { %v137_v57 = vsel %vm120_vm4, %v136_v53, 0.0  ;;  %v138_v58 = vsel %vm121_vm5, %v136_v53, 0.0  ;;  %v139_v59 = vsel %vm122_vm6, %v136_v53, 0.0  ;;  %v140_v61 = vsel %vm123_vm7, %v136_v53, 0.0 }
  0xb4   :  { %157 = vst [vmem:[#allocation2] sm:$0xff] %v137_v57  ;;  %v141_v63 = vsel %vm124_vm8, %v136_v53, 0.0  ;;  %v142_v1 = vsel %vm125_vm9, %v136_v53, 0.0  ;;  %v143_v3 = vsel %vm126_vm10, %v136_v53, 0.0  ;;  %v144_v5 = vsel %vm127_vm11, %v136_v53, 0.0 }
  0xb5   :  { %158 = vst [vmem:[#allocation2 + $0x8] sm:$0xff] %v138_v58  ;;  %v145_v7 = vsel %vm128_vm12, %v136_v53, 0.0  ;;  %v146_v8 = vsel %vm129_vm13, %v136_v53, 0.0  ;;  %v147_v9 = vsel %vm130_vm14, %v136_v53, 0.0  ;;  %v148_v10 = vsel %vm131_vm15, %v136_v53, 0.0 }
  0xb6   :  { %159 = vst [vmem:[#allocation2 + $0x10] sm:$0xff] %v139_v59  ;;  %v149_v11 = vsel %vm132_vm0, %v136_v53, 0.0  ;;  %v150_v12 = vsel %vm133_vm1, %v136_v53, 0.0  ;;  %v151_v13 = vsel %vm134_vm2, %v136_v53, 0.0  ;;  %v152_v14 = vsel %vm135_vm3, %v136_v53, 0.0 }
  0xb7   :  { %160 = vst [vmem:[#allocation2 + $0x18] sm:$0xff] %v140_v61 }
  0xb8   :  { %161 = vst [vmem:[#allocation2 + $0x20] sm:$0xff] %v141_v63 }
  0xb9   :  { %162 = vst [vmem:[#allocation2 + $0x28] sm:$0xff] %v142_v1 }
  0xba   :  { %163 = vst [vmem:[#allocation2 + $0x30] sm:$0xff] %v143_v3 }
  0xbb   :  { %164 = vst [vmem:[#allocation2 + $0x38] sm:$0xff] %v144_v5 }
  0xbc   :  { %165 = vst [vmem:[#allocation2 + $0x40] sm:$0xff] %v145_v7 }
  0xbd   :  { %166 = vst [vmem:[#allocation2 + $0x48] sm:$0xff] %v146_v8 }
  0xbe   :  { %167 = vst [vmem:[#allocation2 + $0x50] sm:$0xff] %v147_v9 }
  0xbf   :  { %168 = vst [vmem:[#allocation2 + $0x58] sm:$0xff] %v148_v10 }
  0xc0   :  { %169 = vst [vmem:[#allocation2 + $0x60] sm:$0xff] %v149_v11 }
  0xc1   :  { %170 = vst [vmem:[#allocation2 + $0x68] sm:$0xff] %v150_v12 }
  0xc2   :  { %171 = vst [vmem:[#allocation2 + $0x70] sm:$0xff] %v151_v13 }
  0xc3   :  { %172 = vst [vmem:[#allocation2 + $0x78] sm:$0xff] %v152_v14 }
  0xc4   :  { %185 = dma.vmem_to_hbm [thread:$0]  %s178_s1, 2048, %s180_s19, [#allocation3], %s240_s20, %s240_s20, %s241_s21  }
  0xc5   :  { %233 = dma.done.wait [#allocation3], 2048  }
  0xc6   :  { %234 = vsyncadd [#allocation3], 4294965248 }
  0xc7   :  { %190 = vsyncpa [#allocation3], 1 }

</bundles_post_ra>
